<compile_context>
chip_gen: v5e
topology: v5e:2x2
jax: 0.10.0
libtpu: 0.0.40
codegen_flags: <defaults>
</compile_context>

<pallas_src>
import jax
import jax.numpy as jnp
from jax.experimental import pallas as pl
from jax.experimental.pallas import tpu as pltpu


# ----------------------------- Pallas kernel -------------------------------

def _sg_fused_kernel(a_ref, x_ref, w_ref, b_ref, o_ref):
    """Fused SG forward for one graph of the batch.

    a_ref: [1, Np, Np]  bf16 normalized adjacency (padded; padded cols are 0)
    x_ref: [1, Np, Fp]  bf16 node features (padded to 128 lanes)
    w_ref: [6, Fp, Fp]  bf16 stacked weights, pre-transposed [in, out], 0-padded
    b_ref: [8, Fp]      f32 stacked biases (rows 6->8 padded), 0-padded
    o_ref: [1, Np, Fp]  f32 output
    """
    a = a_ref[0]                     # [Np, Np] bf16
    h = x_ref[0]                     # [Np, Fp] bf16
    bias = b_ref[...]                # [8, Fp]  f32 (one small load, reused)

    def sgconv(h_bf16, li):
        # graph propagation (MXU, bf16 in / f32 acc)
        p = jnp.dot(a, h_bf16, preferred_element_type=jnp.float32)
        # linear transform + bias + relu (f32), then pack back to bf16
        y = jnp.dot(p.astype(jnp.bfloat16), w_ref[li],
                    preferred_element_type=jnp.float32) + bias[li:li + 1, :]
        return jnp.maximum(y, 0.0).astype(jnp.bfloat16)

    def linear(h_bf16, li):
        return jnp.dot(h_bf16, w_ref[li],
                       preferred_element_type=jnp.float32) + bias[li:li + 1, :]

    # TODO(synk): dropout omitted (module evaluated in eval/inference mode).
    h = sgconv(h, 0)                                                   # conv1 + relu
    h = sgconv(h, 1)                                                   # conv2 + relu
    h = sgconv(h, 2)                                                   # conv3 + relu
    h = jnp.maximum(linear(h, 3), 0.0).astype(jnp.bfloat16)            # lin1 + relu
    h = jnp.maximum(linear(h, 4), 0.0).astype(jnp.bfloat16)            # lin2 + relu
    y = linear(h, 5)                                                   # lin3 (no relu)
    o_ref[0] = y.astype(o_ref.dtype)


def make_sg_forward(num_nodes, dims, batch, n_pad, f_pad):
    """Build the jitted fused forward for a fixed (batch, n_pad, f_pad) config."""
    # Cost estimate from REAL (unpadded) dims.
    flops = 0
    for i, (fin, fout) in enumerate(dims):
        if i < 3:                                       # SGConv: A_hat @ X then X @ W
            flops += 2 * num_nodes * num_nodes * fin
        flops += 2 * num_nodes * fin * fout
    flops *= batch
    bytes_in = (batch * num_nodes * num_nodes * 2       # A_hat bf16
                + batch * num_nodes * dims[0][0] * 2    # x bf16
                + sum(fin * fout * 2 + fout * 4 for fin, fout in dims))
    bytes_out = batch * num_nodes * dims[-1][1] * 4
    cost = pl.CostEstimate(flops=flops, transcendentals=0,
                           bytes_accessed=bytes_in + bytes_out)

    grid_spec = pltpu.PrefetchScalarGridSpec(
        num_scalar_prefetch=0,
        grid=(batch,),
        in_specs=[
            pl.BlockSpec((1, n_pad, n_pad), lambda b: (b, 0, 0)),   # A_hat (per graph)
            pl.BlockSpec((1, n_pad, f_pad), lambda b: (b, 0, 0)),   # X     (per graph)
            pl.BlockSpec((6, f_pad, f_pad), lambda b: (0, 0, 0)),   # weights (resident)
            pl.BlockSpec((8, f_pad), lambda b: (0, 0)),             # biases  (resident)
        ],
        out_specs=pl.BlockSpec((1, n_pad, f_pad), lambda b: (b, 0, 0)),
    )

    fwd = pl.pallas_call(
        _sg_fused_kernel,
        out_shape=jax.ShapeDtypeStruct((batch, n_pad, f_pad), jnp.float32),
        grid_spec=grid_spec,
        compiler_params=pltpu.CompilerParams(
            dimension_semantics=("parallel",)),
        cost_estimate=cost,
    )

    @jax.jit
    def sg_forward(a_hat_b, x_b, w_all, b_all):
        return fwd(a_hat_b, x_b, w_all, b_all)

    return sg_forward


# ------------------------------ Plain-JAX glue ------------------------------

def _round_up(x, m):
    return ((x + m - 1) // m) * m


def _pad_to(a, shape):
    pads = [(0, s - d) for d, s in zip(a.shape, shape)]
    return jnp.pad(a, pads)


def gcn_norm_dense(edge_index, num_nodes):
    """Dense symmetric-normalized adjacency with self-loops:
       A_hat = D^{-1/2} (A + I) D^{-1/2},  A_hat[dst, src] set for edge src->dst."""
    src, dst = edge_index[0], edge_index[1]
    a = jnp.zeros((num_nodes, num_nodes), jnp.float32)
    a = a.at[dst, src].add(1.0)
    a = a + jnp.eye(num_nodes, dtype=jnp.float32)          # add self loops
    deg = jnp.sum(a, axis=1)                                # degree incl. self loop
    dinv = jnp.where(deg > 0, 1.0 / jnp.sqrt(deg), 0.0)
    return dinv[:, None] * a * dinv[None, :]


def layer_dims(in_channels, out_channels):
    return [
        (in_channels,     in_channels * 2),  # conv1
        (in_channels * 2, in_channels * 2),  # conv2
        (in_channels * 2, in_channels * 4),  # conv3
        (in_channels * 4, in_channels * 2),  # lin1
        (in_channels * 2, in_channels),      # lin2
        (in_channels,     out_channels),     # lin3
    ]


def init_params(key, dims):
    """Deterministic synthetic parameters; shapes mirror the PyTorch module.
       Weights stored pre-transposed as [in, out]; biases as [out]."""
    params = []
    for (fin, fout) in dims:
        key, kw, kb = jax.random.split(key, 3)
        scale = 1.0 / jnp.sqrt(jnp.float32(fin))
        w = jax.random.uniform(kw, (fin, fout), jnp.float32, -scale, scale)
        b = jax.random.uniform(kb, (fout,), jnp.float32, -scale, scale)
        params.append((w, b))
    return params


def stack_params(params, f_pad):
    """Stack + zero-pad: weights -> [6, f_pad, f_pad] bf16, biases -> [8, f_pad] f32."""
    w_all = jnp.stack([_pad_to(w, (f_pad, f_pad)) for (w, _) in params]
                      ).astype(jnp.bfloat16)                           # [6, Fp, Fp]
    b_rows = jnp.stack([_pad_to(b, (f_pad,)) for (_, b) in params])    # [6, Fp]
    b_all = _pad_to(b_rows, (8, f_pad)).astype(jnp.float32)            # [8, Fp]
    return w_all, b_all


# ---------------------------------- main ------------------------------------

if __name__ == "__main__":
    in_channels, out_channels = 4, 2
    num_nodes = 8
    batch = 2                                 # batch of graphs -> grid axis
    F_PAD = 128                               # lane-dense feature width
    n_pad = _round_up(num_nodes, 16)          # bf16-tile-aligned row count

    dims = layer_dims(in_channels, out_channels)

    key = jax.random.PRNGKey(0)
    kx, kp = jax.random.split(key)

    params = init_params(kp, dims)
    w_all, b_all = stack_params(params, F_PAD)

    # Build a small batch of graphs (different topologies, same #nodes).
    idx = jnp.arange(num_nodes)
    # graph 0: bidirectional ring
    ring_src = jnp.concatenate([idx, (idx + 1) % num_nodes])
    ring_dst = jnp.concatenate([(idx + 1) % num_nodes, idx])
    edges = [jnp.stack([ring_src, ring_dst]).astype(jnp.int32)]
    # graph 1: star centered at node 0 (both directions)
    star_src = jnp.concatenate([jnp.zeros(num_nodes - 1, jnp.int32), idx[1:]])
    star_dst = jnp.concatenate([idx[1:], jnp.zeros(num_nodes - 1, jnp.int32)])
    edges.append(jnp.stack([star_src, star_dst]).astype(jnp.int32))

    x_keys = jax.random.split(kx, batch)
    a_list, x_list = [], []
    for g in range(batch):
        x_g = jax.random.normal(x_keys[g], (num_nodes, in_channels), jnp.float32)
        a_g = gcn_norm_dense(edges[g], num_nodes)
        # padded cols of A_hat stay zero => padded-row junk never leaks (see header).
        a_list.append(_pad_to(a_g, (n_pad, n_pad)).astype(jnp.bfloat16))
        x_list.append(_pad_to(x_g, (n_pad, F_PAD)).astype(jnp.bfloat16))
    a_hat_b = jnp.stack(a_list)               # [B, Np, Np] bf16
    x_b = jnp.stack(x_list)                   # [B, Np, Fp] bf16

    sg_forward = make_sg_forward(num_nodes, dims, batch, n_pad, F_PAD)

    out_full = sg_forward(a_hat_b, x_b, w_all, b_all)
    out_full = jax.block_until_ready(out_full)
    out = out_full[:, :num_nodes, :out_channels]

    assert out.shape == (batch, num_nodes, out_channels)
    assert out.dtype == jnp.float32
    assert bool(jnp.all(jnp.isfinite(out)))
    print("KERNEL_OK")
</pallas_src>

<mosaic_0001>
module attributes {stable_mosaic.version = 11 : i64} {
  func.func @_sg_fused_kernel(%arg0: i32, %arg1: memref<1x16x16xbf16, #tpu.memory_space<vmem>>, %arg2: memref<1x16x128xbf16, #tpu.memory_space<vmem>>, %arg3: memref<6x128x128xbf16, #tpu.memory_space<vmem>>, %arg4: memref<8x128xf32, #tpu.memory_space<vmem>>, %arg5: memref<1x16x128xf32, #tpu.memory_space<vmem>>) attributes {dimension_semantics = [#tpu.dimension_semantics<parallel>], iteration_bounds = array<i64: 2>, scalar_prefetch = 0 : i64, scratch_operands = 0 : i64, tpu.core_type = #tpu.core_type<tc>, window_params = [{transform_indices = @transform_0, window_bounds = array<i64: 1, 16, 16>}, {transform_indices = @transform_1, window_bounds = array<i64: 1, 16, 128>}, {pipeline_mode = #tpu.pipeline_mode<synchronous>, transform_indices = @transform_2, window_bounds = array<i64: 6, 128, 128>}, {pipeline_mode = #tpu.pipeline_mode<synchronous>, transform_indices = @transform_3, window_bounds = array<i64: 8, 128>}, {transform_indices = @transform_4, window_bounds = array<i64: 1, 16, 128>}]} {
    %c0 = arith.constant 0 : index
    %c0_0 = arith.constant 0 : index
    %c0_1 = arith.constant 0 : index
    %0 = vector.load %arg1[%c0, %c0_0, %c0_1] : memref<1x16x16xbf16, #tpu.memory_space<vmem>>, vector<1x16x16xbf16>
    %1 = vector.shape_cast %0 : vector<1x16x16xbf16> to vector<16x16xbf16>
    %c0_2 = arith.constant 0 : index
    %c0_3 = arith.constant 0 : index
    %c0_4 = arith.constant 0 : index
    %2 = vector.load %arg2[%c0_2, %c0_3, %c0_4] : memref<1x16x128xbf16, #tpu.memory_space<vmem>>, vector<1x16x128xbf16>
    %3 = vector.shape_cast %2 : vector<1x16x128xbf16> to vector<16x128xbf16>
    %c0_5 = arith.constant 0 : index
    %c0_6 = arith.constant 0 : index
    %4 = vector.load %arg4[%c0_5, %c0_6] : memref<8x128xf32, #tpu.memory_space<vmem>>, vector<8x128xf32>
    %cst = arith.constant dense<0.000000e+00> : vector<16x128xf32>
    %5 = tpu.matmul %1, %3, %cst {dimension_numbers = #tpu.dot_dimension_numbers<[1], [0], [0], [1], [0, 0, 1, 1], [], []>} : vector<16x16xbf16>, vector<16x128xbf16>, vector<16x128xf32> -> vector<16x128xf32>
    %6 = arith.truncf %5 : vector<16x128xf32> to vector<16x128xbf16>
    %c0_7 = arith.constant 0 : index
    %c0_8 = arith.constant 0 : index
    %c0_9 = arith.constant 0 : index
    %7 = vector.load %arg3[%c0_7, %c0_8, %c0_9] : memref<6x128x128xbf16, #tpu.memory_space<vmem>>, vector<1x128x128xbf16>
    %8 = vector.shape_cast %7 : vector<1x128x128xbf16> to vector<128x128xbf16>
    %cst_10 = arith.constant dense<0.000000e+00> : vector<16x128xf32>
    %9 = tpu.matmul %6, %8, %cst_10 {dimension_numbers = #tpu.dot_dimension_numbers<[1], [0], [0], [1], [0, 0, 1, 1], [], []>} : vector<16x128xbf16>, vector<128x128xbf16>, vector<16x128xf32> -> vector<16x128xf32>
    %10 = vector.extract_strided_slice %4 {offsets = [0, 0], sizes = [1, 128], strides = [1, 1]} : vector<8x128xf32> to vector<1x128xf32>
    %11 = vector.broadcast %10 : vector<1x128xf32> to vector<16x128xf32>
    %12 = arith.addf %9, %11 : vector<16x128xf32>
    %cst_11 = arith.constant 0.000000e+00 : f32
    %13 = vector.broadcast %cst_11 : f32 to vector<16x128xf32>
    %14 = arith.maximumf %12, %13 : vector<16x128xf32>
    %15 = arith.truncf %14 : vector<16x128xf32> to vector<16x128xbf16>
    %cst_12 = arith.constant dense<0.000000e+00> : vector<16x128xf32>
    %16 = tpu.matmul %1, %15, %cst_12 {dimension_numbers = #tpu.dot_dimension_numbers<[1], [0], [0], [1], [0, 0, 1, 1], [], []>} : vector<16x16xbf16>, vector<16x128xbf16>, vector<16x128xf32> -> vector<16x128xf32>
    %17 = arith.truncf %16 : vector<16x128xf32> to vector<16x128xbf16>
    %c1 = arith.constant 1 : index
    %c0_13 = arith.constant 0 : index
    %c0_14 = arith.constant 0 : index
    %18 = vector.load %arg3[%c1, %c0_13, %c0_14] : memref<6x128x128xbf16, #tpu.memory_space<vmem>>, vector<1x128x128xbf16>
    %19 = vector.shape_cast %18 : vector<1x128x128xbf16> to vector<128x128xbf16>
    %cst_15 = arith.constant dense<0.000000e+00> : vector<16x128xf32>
    %20 = tpu.matmul %17, %19, %cst_15 {dimension_numbers = #tpu.dot_dimension_numbers<[1], [0], [0], [1], [0, 0, 1, 1], [], []>} : vector<16x128xbf16>, vector<128x128xbf16>, vector<16x128xf32> -> vector<16x128xf32>
    %21 = vector.extract_strided_slice %4 {offsets = [1, 0], sizes = [1, 128], strides = [1, 1]} : vector<8x128xf32> to vector<1x128xf32>
    %22 = vector.broadcast %21 : vector<1x128xf32> to vector<16x128xf32>
    %23 = arith.addf %20, %22 : vector<16x128xf32>
    %cst_16 = arith.constant 0.000000e+00 : f32
    %24 = vector.broadcast %cst_16 : f32 to vector<16x128xf32>
    %25 = arith.maximumf %23, %24 : vector<16x128xf32>
    %26 = arith.truncf %25 : vector<16x128xf32> to vector<16x128xbf16>
    %cst_17 = arith.constant dense<0.000000e+00> : vector<16x128xf32>
    %27 = tpu.matmul %1, %26, %cst_17 {dimension_numbers = #tpu.dot_dimension_numbers<[1], [0], [0], [1], [0, 0, 1, 1], [], []>} : vector<16x16xbf16>, vector<16x128xbf16>, vector<16x128xf32> -> vector<16x128xf32>
    %28 = arith.truncf %27 : vector<16x128xf32> to vector<16x128xbf16>
    %c2 = arith.constant 2 : index
    %c0_18 = arith.constant 0 : index
    %c0_19 = arith.constant 0 : index
    %29 = vector.load %arg3[%c2, %c0_18, %c0_19] : memref<6x128x128xbf16, #tpu.memory_space<vmem>>, vector<1x128x128xbf16>
    %30 = vector.shape_cast %29 : vector<1x128x128xbf16> to vector<128x128xbf16>
    %cst_20 = arith.constant dense<0.000000e+00> : vector<16x128xf32>
    %31 = tpu.matmul %28, %30, %cst_20 {dimension_numbers = #tpu.dot_dimension_numbers<[1], [0], [0], [1], [0, 0, 1, 1], [], []>} : vector<16x128xbf16>, vector<128x128xbf16>, vector<16x128xf32> -> vector<16x128xf32>
    %32 = vector.extract_strided_slice %4 {offsets = [2, 0], sizes = [1, 128], strides = [1, 1]} : vector<8x128xf32> to vector<1x128xf32>
    %33 = vector.broadcast %32 : vector<1x128xf32> to vector<16x128xf32>
    %34 = arith.addf %31, %33 : vector<16x128xf32>
    %cst_21 = arith.constant 0.000000e+00 : f32
    %35 = vector.broadcast %cst_21 : f32 to vector<16x128xf32>
    %36 = arith.maximumf %34, %35 : vector<16x128xf32>
    %37 = arith.truncf %36 : vector<16x128xf32> to vector<16x128xbf16>
    %c3 = arith.constant 3 : index
    %c0_22 = arith.constant 0 : index
    %c0_23 = arith.constant 0 : index
    %38 = vector.load %arg3[%c3, %c0_22, %c0_23] : memref<6x128x128xbf16, #tpu.memory_space<vmem>>, vector<1x128x128xbf16>
    %39 = vector.shape_cast %38 : vector<1x128x128xbf16> to vector<128x128xbf16>
    %cst_24 = arith.constant dense<0.000000e+00> : vector<16x128xf32>
    %40 = tpu.matmul %37, %39, %cst_24 {dimension_numbers = #tpu.dot_dimension_numbers<[1], [0], [0], [1], [0, 0, 1, 1], [], []>} : vector<16x128xbf16>, vector<128x128xbf16>, vector<16x128xf32> -> vector<16x128xf32>
    %41 = vector.extract_strided_slice %4 {offsets = [3, 0], sizes = [1, 128], strides = [1, 1]} : vector<8x128xf32> to vector<1x128xf32>
    %42 = vector.broadcast %41 : vector<1x128xf32> to vector<16x128xf32>
    %43 = arith.addf %40, %42 : vector<16x128xf32>
    %cst_25 = arith.constant 0.000000e+00 : f32
    %44 = vector.broadcast %cst_25 : f32 to vector<16x128xf32>
    %45 = arith.maximumf %43, %44 : vector<16x128xf32>
    %46 = arith.truncf %45 : vector<16x128xf32> to vector<16x128xbf16>
    %c4 = arith.constant 4 : index
    %c0_26 = arith.constant 0 : index
    %c0_27 = arith.constant 0 : index
    %47 = vector.load %arg3[%c4, %c0_26, %c0_27] : memref<6x128x128xbf16, #tpu.memory_space<vmem>>, vector<1x128x128xbf16>
    %48 = vector.shape_cast %47 : vector<1x128x128xbf16> to vector<128x128xbf16>
    %cst_28 = arith.constant dense<0.000000e+00> : vector<16x128xf32>
    %49 = tpu.matmul %46, %48, %cst_28 {dimension_numbers = #tpu.dot_dimension_numbers<[1], [0], [0], [1], [0, 0, 1, 1], [], []>} : vector<16x128xbf16>, vector<128x128xbf16>, vector<16x128xf32> -> vector<16x128xf32>
    %50 = vector.extract_strided_slice %4 {offsets = [4, 0], sizes = [1, 128], strides = [1, 1]} : vector<8x128xf32> to vector<1x128xf32>
    %51 = vector.broadcast %50 : vector<1x128xf32> to vector<16x128xf32>
    %52 = arith.addf %49, %51 : vector<16x128xf32>
    %cst_29 = arith.constant 0.000000e+00 : f32
    %53 = vector.broadcast %cst_29 : f32 to vector<16x128xf32>
    %54 = arith.maximumf %52, %53 : vector<16x128xf32>
    %55 = arith.truncf %54 : vector<16x128xf32> to vector<16x128xbf16>
    %c5 = arith.constant 5 : index
    %c0_30 = arith.constant 0 : index
    %c0_31 = arith.constant 0 : index
    %56 = vector.load %arg3[%c5, %c0_30, %c0_31] : memref<6x128x128xbf16, #tpu.memory_space<vmem>>, vector<1x128x128xbf16>
    %57 = vector.shape_cast %56 : vector<1x128x128xbf16> to vector<128x128xbf16>
    %cst_32 = arith.constant dense<0.000000e+00> : vector<16x128xf32>
    %58 = tpu.matmul %55, %57, %cst_32 {dimension_numbers = #tpu.dot_dimension_numbers<[1], [0], [0], [1], [0, 0, 1, 1], [], []>} : vector<16x128xbf16>, vector<128x128xbf16>, vector<16x128xf32> -> vector<16x128xf32>
    %59 = vector.extract_strided_slice %4 {offsets = [5, 0], sizes = [1, 128], strides = [1, 1]} : vector<8x128xf32> to vector<1x128xf32>
    %60 = vector.broadcast %59 : vector<1x128xf32> to vector<16x128xf32>
    %61 = arith.addf %58, %60 : vector<16x128xf32>
    %c0_33 = arith.constant 0 : index
    %c0_34 = arith.constant 0 : index
    %c0_35 = arith.constant 0 : index
    %62 = vector.load %arg5[%c0_33, %c0_34, %c0_35] : memref<1x16x128xf32, #tpu.memory_space<vmem>>, vector<1x16x128xf32>
    %63 = vector.shape_cast %62 : vector<1x16x128xf32> to vector<16x128xf32>
    %64 = vector.shape_cast %61 : vector<16x128xf32> to vector<1x16x128xf32>
    tpu.vector_store %arg5[%c0_33, %c0_34, %c0_35], %64 {strides = array<i32>} : memref<1x16x128xf32, #tpu.memory_space<vmem>>, vector<1x16x128xf32>,
    return
  }
  func.func @transform_0(%arg0: i32) -> (i32, i32, i32) {
    %c0_i32 = arith.constant 0 : i32
    %c0_i32_0 = arith.constant 0 : i32
    %c0_i32_1 = arith.constant 0 : i32
    return %arg0, %c0_i32, %c0_i32_0 : i32, i32, i32
  }
  func.func @transform_1(%arg0: i32) -> (i32, i32, i32) {
    %c0_i32 = arith.constant 0 : i32
    %c0_i32_0 = arith.constant 0 : i32
    %c0_i32_1 = arith.constant 0 : i32
    return %arg0, %c0_i32, %c0_i32_0 : i32, i32, i32
  }
  func.func @transform_2(%arg0: i32) -> (i32, i32, i32) {
    %c0_i32 = arith.constant 0 : i32
    %c0_i32_0 = arith.constant 0 : i32
    %c0_i32_1 = arith.constant 0 : i32
    %c0_i32_2 = arith.constant 0 : i32
    return %c0_i32, %c0_i32_0, %c0_i32_1 : i32, i32, i32
  }
  func.func @transform_3(%arg0: i32) -> (i32, i32) {
    %c0_i32 = arith.constant 0 : i32
    %c0_i32_0 = arith.constant 0 : i32
    %c0_i32_1 = arith.constant 0 : i32
    return %c0_i32, %c0_i32_0 : i32, i32
  }
  func.func @transform_4(%arg0: i32) -> (i32, i32, i32) {
    %c0_i32 = arith.constant 0 : i32
    %c0_i32_0 = arith.constant 0 : i32
    %c0_i32_1 = arith.constant 0 : i32
    return %arg0, %c0_i32, %c0_i32_0 : i32, i32, i32
  }
}

</mosaic_0001>

<bundles_post_ra>
// kernel: sg_forward.1
= control target key start
LH: loop header
LB: loop body
LE: loop exit
PB: predicated region body
PF: predicated region fallthrough
CT: control target
= control target key end

     0   :  { %s1767_s0 = inlined_call_operand.hbm [shape: bf16[2,16,16], index: 0, kind: input, shape index: {}]   ;;  %s1768_s1 = inlined_call_operand.hbm [shape: bf16[2,16,128], index: 1, kind: input, shape index: {}]   ;;  %s1769_s2 = inlined_call_operand.hbm [shape: bf16[6,128,128], index: 2, kind: input, shape index: {}]   ;;  %s1770_s3 = inlined_call_operand.hbm [shape: f32[8,128], index: 3, kind: input, shape index: {}]   ;;  %s1771_s4 = inlined_call_operand.hbm [shape: f32[2,16,128], index: 4, kind: output, shape index: {}]  }
   0x1   :  { %1776 = sst [smem:[#allocation16_spill]] %s1767_s0 }
   0x2   :  { %1777 = sst [smem:[#allocation17_spill]] %s1769_s2 }
   0x3   :  { %1778 = sst [smem:[#allocation18_spill]] %s1770_s3 }
   0x4   :  { %9 = vsyncpa [#allocation3], 0 }
   0x5   :  { %11 = vsyncpa [#allocation3 + $0x1], 0 }
   0x6   :  { %12 = vsyncpa [#allocation6], 0 }
   0x7   :  { %14 = vsyncpa [#allocation6 + $0x1], 0 }
   0x8   :  { %15 = vsyncpa [#allocation9], 0 }
   0x9   :  { %16 = vsyncpa [#allocation4], 0 }
   0xa   :  { %18 = vsyncpa [#allocation4 + $0x1], 0  ;;  %s1569_s15 = smov 0   ;;  %s1571_s16 = smov 0  }
   0xb   :  { %s1573_s17 = smov 0   ;;  %s1575_s18 = smov 0  }
   0xc LB: > { %s1590_s19 = sadd.s32 4294967295, %s1536_s18   ;;  %s984_s20 = sadd.s32 4294967294, %s1536_s18   ;;  %s1536_s18 = sphi %s1575_s18, %s1793_s18   ;;  %s1532_s17 = sphi %s1573_s17, %s1792_s17   ;;  %s1528_s16 = sphi %s1571_s16, %s1791_s16   ;;  %s1524_s15 = sphi %s1569_s15, %s1790_s15  }
   0xd   : > { %p44_p0 = scmp.ne.s32.totalorder %s1528_s16, %s1524_s15  ;;  %p45_p1 = scmp.eq.s32.totalorder %s1590_s19, 0 }
   0xe   : > { %p136_p2 = scmp.eq.s32.totalorder %s1590_s19, 1  ;;  %p142_p3 = scmp.eq.s32.totalorder %s984_s20, 1 }
   0xf   : > { %p1599_p4 = por %p45_p1, %p44_p0  ;;  %p985_p5 = scmp.ge.s32.totalorder %s1536_s18, 1 }
  0x10   : > { %p1604_p6 = por %p142_p3, %p44_p0  ;;  %p149_p7 = scmp.lt.s32.totalorder %s1536_s18, 3 }
  0x11   : > { %s1781_s2 = sld [smem:[#allocation17_spill]]  ;;  %s1538_s27 = smov [#allocation7]  }
  0x12   : > { %p1612_p8 = pnand %p985_p5, %p149_p7  ;;  %s162_s28 = sshll.u32 %s1538_s27, 4  ;;  %s163_s28 = int_to_ptr.vmem [resolvable:$true] %s162_s28 }
  0x13   : > { %s1783_s3 = sld [smem:[#allocation18_spill]]  ;;  %s1772_s6 = smov 64  }
  0x14   : > { %p1276_p9 = pneg %p1612_p8  ;;  %s1774_s7 = smov 4  }
  0x15   : > { %s1541_s8 = smov [#allocation8]   ;;  %s1628_s10 = sadd.s32 1, %s1536_s18  }
  0x16   : > { %p1277_p10 = pnand %p1276_p9, %p45_p1  ;;  %s177_s9 = sshll.u32 %s1541_s8, 4  ;;  %s178_s9 = int_to_ptr.vmem [resolvable:$true] %s177_s9 }
  0x17   : > { %s160_s25 = sshll.u32 %s1781_s2, 4  ;;  %s31_s11 = sadd.s32 1, %s1532_s17  ;;  %s161_s25 = int_to_ptr.hbm [resolvable:$true] %s160_s25 }
  0x18   : > { %1279 = dma.hbm_to_vmem [thread:$0]  (!%p1277_p10), %s161_s25, 6144, %s163_s28, [#allocation6], %s1772_s6, %s1772_s6, %s1774_s7  }
  0x19   : > { %s175_s5 = sshll.u32 %s1783_s3, 4  ;;  %s28_s12 = ssub.s32 %s1536_s18, %s1628_s10  ;;  %s176_s5 = int_to_ptr.hbm [resolvable:$true] %s175_s5 }
  0x1a   : > { %1282 = dma.hbm_to_vmem [thread:$0]  (!%p1277_p10), %s176_s5, 128, %s178_s9, [#allocation9]  }
  0x1b   : > { %p38_p12 = scmp.ne.s32.totalorder %s1532_s17, %s1528_s16  ;;  %p29_p13 = scmp.eq.s32.totalorder %s28_s12, 0 }
  0x1c   : > { %p39_p0 = scmp.eq.s32.totalorder %s1536_s18, 0  ;;  %p1296_p5 = scmp.lt.s32.totalorder %s1536_s18, 2 }
  0x1d   : > { %p1638_p3 = por %p136_p2, %p38_p12  ;;  %s188_s20 = sand.u32 1, %s1532_s17  }
  0x1e   : > { %s1644_s14 = scalar_select %p29_p13, %s1532_s17, %s31_s11  }
  0x1f   : > { %p40_p7 = por %p39_p0, %p38_p12  ;;  %s1647_s23 = sshll.u32 %s188_s20, 3 }
  0x20   : > { %s1209_s24 = sshll.u32 %s1536_s18, 3  ;;  %s1785_s0 = sld [smem:[#allocation16_spill]] }
  0x21   : > { %s192_s29 = scalar_lea.vmem [#allocation2], %s1647_s23  ;;  %p1654_p2 = pnand %p1296_p5, %p40_p7 }
  0x22   : > { %s200_s30 = sshll.u32 %s192_s29, 4  ;;  %s219_s12 = scalar_lea.hbm %s1768_s1, %s1209_s24  ;;  %s201_s30 = int_to_ptr.vmem [resolvable:$true] %s200_s30 }
  0x23   : > { %s220_s6 = sshll.u32 %s219_s12, 4  ;;  %s189_s7 = scalar_lea.sflag [#allocation3], %s188_s20  ;;  %s221_s6 = int_to_ptr.hbm [resolvable:$true] %s220_s6 }
  0x24   : > { %p1402_p10 = pneg %p1654_p2 }
  0x26   : > { %s197_s28 = scalar_lea.hbm %s1785_s0, %s1209_s24  ;;  %s1405_s29 = scalar_lea.hbm %s1785_s0, 16 }
  0x27   : > { %s198_s5 = sshll.u32 %s197_s28, 4  ;;  %s199_s5 = int_to_ptr.hbm [resolvable:$true] %s198_s5 }
  0x28   : > { %s1398_s2 = sshra.s32 %s199_s5, 4  ;;  %s1399_s2 = int_to_ptr.hbm [resolvable:$true] %s1398_s2 }
  0x29   : > { %s1400_s25 = scalar_lea.hbm %s1399_s2, 8  ;;  %p1406_p0 = scmp.lt.s32.totalorder %s1399_s2, %s1785_s0 }
  0x2a   : > { %p1401_p9 = scmp.ne.s32.totalorder %s1399_s2, %s1400_s25  ;;  %p1407_p5 = scmp.lt.s32.totalorder %s1405_s29, %s1400_s25 }
  0x2c   : > { %p1403_p12 = pnand %p1402_p10, %p1401_p9  ;;  %p1408_p7 = por %p1407_p5, %p1406_p0 }
  0x2e   : > { %p1404_p13 = pneg %p1403_p12 }
  0x30   : > { %p1409_p11 = pnand %p1408_p7, %p1404_p13 }
  0x32   : > { %1412 = shalt.err (!%p1409_p11)
}
  0x33   : > { %s1787_s20 = smov 4   ;;  %s1788_s24 = smov 64  }
  0x34   : > { %1286 = dma.hbm_to_vmem [thread:$0]  (!%p1654_p2), %s199_s5, 128, %s201_s30, %s189_s7, %s1788_s24, %s1788_s24, %s1787_s20  }
  0x35   : > { %s214_s12 = scalar_lea.vmem [#allocation5], %s1647_s23  ;;  %s210_s28 = sand.u32 1, %s1536_s18  }
  0x36   : > { %s222_s27 = sshll.u32 %s214_s12, 4  ;;  %s211_s9 = scalar_lea.sflag [#allocation6], %s210_s28  ;;  %s223_s27 = int_to_ptr.vmem [resolvable:$true] %s222_s27 }
  0x37   : > { %s1428_s2 = sshra.s32 %s221_s6, 4  ;;  %s1435_s0 = scalar_lea.hbm %s1768_s1, 16  ;;  %s1429_s2 = int_to_ptr.hbm [resolvable:$true] %s1428_s2 }
  0x38   : > { %s1430_s25 = scalar_lea.hbm %s1429_s2, 8  ;;  %p1436_p13 = scmp.lt.s32.totalorder %s1429_s2, %s1768_s1 }
  0x39   : > { %p1431_p9 = scmp.ne.s32.totalorder %s1429_s2, %s1430_s25  ;;  %p1437_p0 = scmp.lt.s32.totalorder %s1435_s0, %s1430_s25 }
  0x3b   : > { %p1433_p11 = pnand %p1431_p9, %p1402_p10  ;;  %p1438_p5 = por %p1437_p0, %p1436_p13 }
  0x3d   : > { %p1434_p12 = pneg %p1433_p11 }
  0x3f   : > { %p1439_p7 = pnand %p1438_p5, %p1434_p12 }
  0x41   : > { %1442 = shalt.err (!%p1439_p7)
}
  0x42   : > { %1289 = dma.hbm_to_vmem [thread:$0]  (!%p1654_p2), %s221_s6, 128, %s223_s27, %s211_s9, %s1788_s24, %s1788_s24, %s1787_s20  }
  0x43   : > { %234 = sbr.rel (%p1612_p8) target bundleno = 1362 (0x552), region = 36  ;;  %s1696_s23 = sand.u32 (!%p1612_p8), 1, %s1528_s16  }
  0x44   : > { %s996_s3 = sshll.u32 (!%p1612_p8), %s1696_s23, 3  ;;  %s237_s0 = scalar_lea.sflag (!%p1612_p8), [#allocation3], %s1696_s23 }
  0x45   : > { %s240_s30 = scalar_lea.vmem (!%p1612_p8), [#allocation2], %s996_s3 }
  0x48   : > { %1503 = dma.done.wait (%p1599_p4), %s237_s0, 128  }
  0x49   : > { %1505 = vsyncadd (%p1599_p4), %s237_s0, 4294967168  ;;  %s246_s6 = sand.u32 1, %s1590_s19   ;;  %s250_s26 = scalar_lea.vmem [#allocation5], %s996_s3 }
  0x4a   : > { %s247_s5 = scalar_lea.sflag [#allocation6], %s246_s6 }
  0x4b   : > { %1507 = dma.done.wait (%p1599_p4), %s247_s5, 128  }
  0x4c   : > { %1509 = vsyncadd (%p1599_p4), %s247_s5, 4294967168 }
  0x4d   : > { %1511 = dma.done.wait (%p45_p1), [#allocation6], 6144  }
  0x4e   : > { %1513 = vsyncadd (%p45_p1), [#allocation6], 4294961152 }
  0x4f   : > { %1515 = dma.done.wait (%p45_p1), [#allocation9], 128  }
  0x50   : > { %1517 = vsyncadd (%p45_p1), [#allocation9], 4294967168  ;;  %v1212_v0 = vld [vmem:[%s250_s26] sm:$0xff]  ;;  %v1717_v2 = vld [vmem:[%s240_s30] sm:$0xff]  ;;  %vm308_vm0 = vcmask 130048   ;;  %s1000_s21 = sshll.u32 %s1696_s23, 4 }
  0x51   : > { %v1220_v1 = vld [vmem:[#allocation7 + $0x38] sm:$0xff]  ;;  %319 = vmatpush.bf16.msra.mxu0 %v1212_v0  ;;  %v1219_v3 = vld [vmem:[#allocation7 + $0x30] sm:$0xff]  ;;  %v1218_v4 = vld [vmem:[#allocation7 + $0x28] sm:$0xff]  ;;  %s1261_s8 = sshll.u32 %s1590_s19, 4  ;;  %s290_s27 = scalar_lea.vmem [#allocation10], %s1000_s21 }
  0x52   : > { %392 = vmatpush.bf16.msra.mxu1 %v1220_v1  ;;  %v1217_v5 = vld [vmem:[#allocation7 + $0x20] sm:$0xff]  ;;  %v1216_v6 = vld [vmem:[#allocation7 + $0x18] sm:$0xff]  ;;  %v1215_v7 = vld [vmem:[#allocation7 + $0x10] sm:$0xff]  ;;  %s865_s12 = scalar_lea.hbm %s1771_s4, %s1261_s8  ;;  %s866_s28 = sshll.u32 %s290_s27, 4  ;;  %s867_s28 = int_to_ptr.vmem [resolvable:$true] %s866_s28 }
  0x53   : > { %v1214_v8 = vld [vmem:[#allocation7 + $0x8] sm:$0xff]  ;;  %v1213_v9 = vld [vmem:[#allocation7] sm:$0xff]  ;;  %v1228_v13 = vld [vmem:[#allocation7 + $0x78] sm:$0xff]  ;;  %s868_s9 = sshll.u32 %s865_s12, 4  ;;  %s854_s2 = scalar_lea.sflag [#allocation4], %s1696_s23  ;;  %s869_s9 = int_to_ptr.hbm [resolvable:$true] %s868_s9 }
  0x54   : > { %1009 = vmatmul.msk.bf16.vlgmr.msra.gmra.mxu0 %vm308_vm0, %v1717_v2  ;;  %490 = vmatpush.bf16.msra.mxu3 %v1228_v13  ;;  %v1227_v14 = vld [vmem:[#allocation7 + $0x70] sm:$0xff]  ;;  %v1226_v15 = vld [vmem:[#allocation7 + $0x68] sm:$0xff]  ;;  %v1225_v16 = vld [vmem:[#allocation7 + $0x60] sm:$0xff]  ;;  %s1472_s25 = sshra.s32 %s869_s9, 4  ;;  %s1478_s7 = scalar_lea.hbm %s1771_s4, 32  ;;  %s1473_s25 = int_to_ptr.hbm [resolvable:$true] %s1472_s25 }
  0x55   : > { %v1721_v17 = vld [vmem:[#allocation8] sm:$0xff]  ;;  %v1224_v19 = vld [vmem:[#allocation7 + $0x58] sm:$0xff]  ;;  %v1223_v27 = vld [vmem:[#allocation7 + $0x50] sm:$0xff]  ;;  %s1474_s19 = scalar_lea.hbm %s1473_s25, 16  ;;  %p1479_p2 = scmp.lt.s32.totalorder %s1473_s25, %s1771_s4 }
  0x56   : > { %393 = vmatpush.bf16.msra.mxu1 %v1219_v3  ;;  %v343_v20 = vperm.slane %v1721_v17, 0  ;;  %v1222_v28 = vld [vmem:[#allocation7 + $0x48] sm:$0xff]  ;;  %v1221_v29 = vld [vmem:[#allocation7 + $0x40] sm:$0xff]  ;;  %v1236_v33 = vld [vmem:[#allocation7 + $0xb8] sm:$0xff]  ;;  %v441_v39 = vperm.slane %v1721_v17, 1  ;;  %v539_v1 = vperm.slane %v1721_v17, 2  ;;  %p1475_p1 = scmp.ne.s32.totalorder %s1473_s25, %s1474_s19  ;;  %p1480_p10 = scmp.lt.s32.totalorder %s1478_s7, %s1474_s19 }
  0x57   : > { %v1235_v34 = vld [vmem:[#allocation7 + $0xb0] sm:$0xff]  ;;  %v1234_v35 = vld [vmem:[#allocation7 + $0xa8] sm:$0xff]  ;;  %v1233_v36 = vld [vmem:[#allocation7 + $0xa0] sm:$0xff] }
  0x58   : > { %491 = vmatpush.bf16.msra.mxu3 %v1227_v14  ;;  %v1232_v38 = vld [vmem:[#allocation7 + $0x98] sm:$0xff]  ;;  %v1231_v46 = vld [vmem:[#allocation7 + $0x90] sm:$0xff]  ;;  %v1230_v47 = vld [vmem:[#allocation7 + $0x88] sm:$0xff]  ;;  %p1476_p4 = pnand %p1475_p1, %p1638_p3  ;;  %p1481_p9 = por %p1480_p10, %p1479_p2 }
  0x59   : > { %v1229_v48 = vld [vmem:[#allocation7 + $0x80] sm:$0xff]  ;;  %v1244_v49 = vld [vmem:[#allocation7 + $0xf8] sm:$0xff]  ;;  %v1243_v50 = vld [vmem:[#allocation7 + $0xf0] sm:$0xff] }
  0x5a   : > { %394 = vmatpush.bf16.msra.mxu1 %v1218_v4  ;;  %v1242_v51 = vld [vmem:[#allocation7 + $0xe8] sm:$0xff]  ;;  %v1241_v52 = vld [vmem:[#allocation7 + $0xe0] sm:$0xff]  ;;  %v1240_v56 = vld [vmem:[#allocation7 + $0xd8] sm:$0xff]  ;;  %p1477_p8 = pneg %p1476_p4 }
  0x5b   : > { %v1239_v57 = vld [vmem:[#allocation7 + $0xd0] sm:$0xff]  ;;  %v1238_v58 = vld [vmem:[#allocation7 + $0xc8] sm:$0xff]  ;;  %v1237_v59 = vld [vmem:[#allocation7 + $0xc0] sm:$0xff] }
  0x5c   : > { %492 = vmatpush.bf16.msra.mxu3 %v1226_v15  ;;  %v1252_v60 = vld [vmem:[#allocation7 + $0x138] sm:$0xff]  ;;  %v1251_v61 = vld [vmem:[#allocation7 + $0x130] sm:$0xff]  ;;  %v1250_v62 = vld [vmem:[#allocation7 + $0x128] sm:$0xff]  ;;  %p1482_p11 = pnand %p1481_p9, %p1477_p8 }
  0x5d   : > { %v1249_v63 = vld [vmem:[#allocation7 + $0x120] sm:$0xff]  ;;  %v1259_v13 = vld [vmem:[#allocation7 + $0x170] sm:$0xff]  ;;  %v1258_v14 = vld [vmem:[#allocation7 + $0x168] sm:$0xff] }
  0x5e   : > { %395 = vmatpush.bf16.msra.mxu1 %v1217_v5  ;;  %v1257_v15 = vld [vmem:[#allocation7 + $0x160] sm:$0xff] }
  0x60   : > { %493 = vmatpush.bf16.msra.mxu3 %v1225_v16 }
  0x62   : > { %396 = vmatpush.bf16.msra.mxu1 %v1216_v6 }
  0x64   : > { %494 = vmatpush.bf16.msra.mxu3 %v1224_v19 }
  0x66   : > { %397 = vmatpush.bf16.msra.mxu1 %v1215_v7 }
  0x68   : > { %495 = vmatpush.bf16.msra.mxu3 %v1223_v27  ;;  %v1254_v27 = vld [vmem:[#allocation7 + $0x148] sm:$0xff] }
  0x6a   : > { %398 = vmatpush.bf16.msra.mxu1 %v1214_v8  ;;  %v1248_v8 = vld [vmem:[#allocation7 + $0x118] sm:$0xff] }
  0x6c   : > { %496 = vmatpush.bf16.msra.mxu3 %v1222_v28  ;;  %v1253_v28 = vld [vmem:[#allocation7 + $0x140] sm:$0xff] }
  0x6e   : > { %399 = vmatpush.bf16.msra.mxu1 %v1213_v9  ;;  %v1247_v9 = vld [vmem:[#allocation7 + $0x110] sm:$0xff] }
  0x70   : > { %497 = vmatpush.bf16.msra.mxu3 %v1221_v29 }
  0x72   : > { %754 = vmatpush.bf16.msrb.mxu1 %v1252_v60 }
  0x76   : > { %755 = vmatpush.bf16.msrb.mxu1 %v1251_v61 }
  0x7a   : > { %756 = vmatpush.bf16.msrb.mxu1 %v1250_v62 }
  0x7e   : > { %757 = vmatpush.bf16.msrb.mxu1 %v1249_v63 }
  0x82   : > { %758 = vmatpush.bf16.msrb.mxu1 %v1248_v8 }
  0x86   : > { %759 = vmatpush.bf16.msrb.mxu1 %v1247_v9 }
  0xd1   : > { %v321_v10 = vpop.f32.mrf.mxu0 }
  0xd9   : > { %v323_v11 = vpop.f32.mrf.mxu0 }
  0xda   : > { %v326_v12 = vpack.c.bf16 %v323_v11, %v321_v10  ;;  %v1246_v10 = vld [vmem:[#allocation7 + $0x108] sm:$0xff]  ;;  %v1245_v11 = vld [vmem:[#allocation7 + $0x100] sm:$0xff] }
  0xdb   : > { %760 = vmatpush.bf16.msrb.mxu1 %v1246_v10 }
  0xdc   : > { %400 = vmatmul.bf16.vlgmr.msra.gmra.mxu1 %v326_v12  ;;  %v1260_v12 = vld [vmem:[#allocation7 + $0x178] sm:$0xff] }
  0xdd   : > { %837 = vmatpush.bf16.msrb.mxu3 %v1260_v12 }
  0xdf   : > { %761 = vmatpush.bf16.msrb.mxu1 %v1245_v11 }
  0xe1   : > { %838 = vmatpush.bf16.msrb.mxu3 %v1259_v13 }
  0xe5   : > { %839 = vmatpush.bf16.msrb.mxu3 %v1258_v14 }
  0xe9   : > { %840 = vmatpush.bf16.msrb.mxu3 %v1257_v15 }
 0x159   : > { %v401_v18 = vpop.f32.mrf.mxu1 }
 0x15a   : > { %v402_v21 = vadd.f32 %v401_v18, %v343_v20  ;;  %v622_v18 = vperm.slane %v1721_v17, 3 }
 0x15c   : > { %v406_v24 = vmax.f32 %v402_v21, 0.0 }
 0x161   : > { %v403_v22 = vpop.f32.mrf.mxu1 }
 0x162   : > { %v404_v23 = vadd.f32 %v403_v22, %v343_v20 }
 0x164   : > { %v407_v25 = vmax.f32 %v404_v23, 0.0 }
 0x166   : > { %v408_v26 = vpack.c.bf16 %v407_v25, %v406_v24  ;;  %v1256_v25 = vld [vmem:[#allocation7 + $0x158] sm:$0xff] }
 0x167   : > { %841 = vmatpush.bf16.msrb.mxu3 %v1256_v25 }
 0x168   : > { %416 = vmatpush.bf16.msra.mxu2 %v408_v26  ;;  %v1255_v26 = vld [vmem:[#allocation7 + $0x150] sm:$0xff] }
 0x16b   : > { %1042 = vmatmul.msk.bf16.vlgmr.msra.gmra.mxu2 %vm308_vm0, %v1717_v2  ;;  %842 = vmatpush.bf16.msrb.mxu3 %v1255_v26 }
 0x16c   : > { %588 = vmatpush.bf16.msrb.mxu2 %v1236_v33 }
 0x16f   : > { %843 = vmatpush.bf16.msrb.mxu3 %v1254_v27 }
 0x170   : > { %589 = vmatpush.bf16.msrb.mxu2 %v1235_v34 }
 0x173   : > { %844 = vmatpush.bf16.msrb.mxu3 %v1253_v28 }
 0x174   : > { %590 = vmatpush.bf16.msrb.mxu2 %v1234_v35 }
 0x178   : > { %591 = vmatpush.bf16.msrb.mxu2 %v1233_v36 }
 0x17c   : > { %592 = vmatpush.bf16.msrb.mxu2 %v1232_v38 }
 0x180   : > { %593 = vmatpush.bf16.msrb.mxu2 %v1231_v46 }
 0x184   : > { %594 = vmatpush.bf16.msrb.mxu2 %v1230_v47 }
 0x188   : > { %595 = vmatpush.bf16.msrb.mxu2 %v1229_v48 }
 0x1ee   : > { %v418_v30 = vpop.f32.mrf.mxu2 }
 0x1f6   : > { %v420_v31 = vpop.f32.mrf.mxu2 }
 0x1f7   : > { %v423_v32 = vpack.c.bf16 %v420_v31, %v418_v30  ;;  %v705_v30 = vperm.slane %v1721_v17, 4 }
 0x1f9   : > { %498 = vmatmul.bf16.vlgmr.msra.gmra.mxu3 %v423_v32 }
 0x27c   : > { %v499_v37 = vpop.f32.mrf.mxu3 }
 0x27d   : > { %v500_v40 = vadd.f32 %v499_v37, %v441_v39  ;;  %v788_v37 = vperm.slane %v1721_v17, 5 }
 0x27f   : > { %v504_v43 = vmax.f32 %v500_v40, 0.0 }
 0x284   : > { %v501_v41 = vpop.f32.mrf.mxu3 }
 0x285   : > { %v502_v42 = vadd.f32 %v501_v41, %v441_v39 }
 0x287   : > { %v505_v44 = vmax.f32 %v502_v42, 0.0 }
 0x289   : > { %v506_v45 = vpack.c.bf16 %v505_v44, %v504_v43 }
 0x28b   : > { %514 = vmatpush.bf16.msrb.mxu0 %v506_v45 }
 0x28e   : > { %1075 = vmatmul.msk.bf16.vlgmr.msrb.gmra.mxu0 %vm308_vm0, %v1717_v2 }
 0x28f   : > { %671 = vmatpush.bf16.msra.mxu0 %v1244_v49 }
 0x293   : > { %672 = vmatpush.bf16.msra.mxu0 %v1243_v50 }
 0x297   : > { %673 = vmatpush.bf16.msra.mxu0 %v1242_v51 }
 0x29b   : > { %674 = vmatpush.bf16.msra.mxu0 %v1241_v52 }
 0x29f   : > { %675 = vmatpush.bf16.msra.mxu0 %v1240_v56 }
 0x2a3   : > { %676 = vmatpush.bf16.msra.mxu0 %v1239_v57 }
 0x2a7   : > { %677 = vmatpush.bf16.msra.mxu0 %v1238_v58 }
 0x2ab   : > { %678 = vmatpush.bf16.msra.mxu0 %v1237_v59 }
 0x30b   : > { %v516_v53 = vpop.f32.mrf.mxu0 }
 0x313   : > { %v518_v54 = vpop.f32.mrf.mxu0 }
 0x314   : > { %v521_v55 = vpack.c.bf16 %v518_v54, %v516_v53 }
 0x316   : > { %596 = vmatmul.bf16.vlgmr.msrb.gmra.mxu2 %v521_v55 }
 0x399   : > { %v597_v0 = vpop.f32.mrf.mxu2 }
 0x39a   : > { %v598_v2 = vadd.f32 %v597_v0, %v539_v1 }
 0x39c   : > { %v602_v5 = vmax.f32 %v598_v2, 0.0 }
 0x3a1   : > { %v599_v3 = vpop.f32.mrf.mxu2 }
 0x3a2   : > { %v600_v4 = vadd.f32 %v599_v3, %v539_v1 }
 0x3a4   : > { %v603_v6 = vmax.f32 %v600_v4, 0.0 }
 0x3a6   : > { %v604_v7 = vpack.c.bf16 %v603_v6, %v602_v5 }
 0x3a8   : > { %679 = vmatmul.bf16.vlgmr.msra.gmra.mxu0 %v604_v7 }
 0x425   : > { %v680_v16 = vpop.f32.mrf.mxu0 }
 0x426   : > { %v681_v19 = vadd.f32 %v680_v16, %v622_v18 }
 0x428   : > { %v685_v22 = vmax.f32 %v681_v19, 0.0 }
 0x42d   : > { %v682_v20 = vpop.f32.mrf.mxu0 }
 0x42e   : > { %v683_v21 = vadd.f32 %v682_v20, %v622_v18 }
 0x430   : > { %v686_v23 = vmax.f32 %v683_v21, 0.0 }
 0x432   : > { %v687_v24 = vpack.c.bf16 %v686_v23, %v685_v22 }
 0x434   : > { %762 = vmatmul.bf16.vlgmr.msrb.gmra.mxu1 %v687_v24 }
 0x4b1   : > { %v763_v29 = vpop.f32.mrf.mxu1 }
 0x4b2   : > { %v764_v31 = vadd.f32 %v763_v29, %v705_v30 }
 0x4b4   : > { %v768_v34 = vmax.f32 %v764_v31, 0.0 }
 0x4b9   : > { %v765_v32 = vpop.f32.mrf.mxu1 }
 0x4ba   : > { %v766_v33 = vadd.f32 %v765_v32, %v705_v30 }
 0x4bc   : > { %v769_v35 = vmax.f32 %v766_v33, 0.0 }
 0x4be   : > { %v770_v36 = vpack.c.bf16 %v769_v35, %v768_v34 }
 0x4c0   : > { %845 = vmatmul.bf16.vlgmr.msrb.gmra.mxu3 %v770_v36 }
 0x543   : > { %v846_v38 = vpop.f32.mrf.mxu3 }
 0x544   : > { %v847_v39 = vadd.f32 %v846_v38, %v788_v37 }
 0x546   : > { %851 = vst [vmem:[%s290_s27] sm:$0xff] %v847_v39 }
 0x54b   : > { %v848_v40 = vpop.f32.mrf.mxu3 }
 0x54c   : > { %v849_v41 = vadd.f32 %v848_v40, %v788_v37 }
 0x54e   : > { %852 = vst [vmem:[%s290_s27 + $0x8] sm:$0xff] %v849_v41 }
 0x54f   : > { %1485 = shalt.err (!%p1482_p11)
}
 0x550   : > { %s1542_s23 = smov 128   ;;  %s1543_s30 = smov 8  }
 0x551   : > { %1274 = dma.vmem_to_hbm [thread:$0]  (%p1638_p3), %s867_s28, 256, %s869_s9, %s854_s2, %s1542_s23, %s1542_s23, %s1543_s30  }
 0x552 PF: > { %s883_s6 = sand.u32 1, %s1524_s15   ;;  %p1789_p12 = scmp.ge.s32.totalorder %s1536_s18, 2 }
 0x553   : > { %s884_s5 = scalar_lea.sflag [#allocation4], %s883_s6 }
 0x554   : > { %p1291_p13 = pnand %p1789_p12, %p1604_p6 }
 0x556   : > { %p1292_p0 = pneg %p1291_p13 }
 0x558   : > { %1519 = dma.done.wait (%p1292_p0), %s884_s5, 256  }
 0x559   : > { %1521 = vsyncadd (%p1292_p0), %s884_s5, 4294967040  ;;  %p21_p5 = scmp.ge.s32.totalorder %s1628_s10, 4   ;;  %s1790_s15 = smov %s1528_s16 }
 0x55a   : > { %s1791_s16 = smov %s1532_s17  ;;  %s1792_s17 = smov %s1644_s14 }
 0x55b   : > { %s1793_s18 = smov %s1628_s10  ;;  %23 = sbr.rel (!%p21_p5) target bundleno = 12 (0xc), region = 107 }
 0x560   :  { %890 = vsyncpa [#allocation3], 1 }
 0x561   :  { %892 = vsyncpa [#allocation3 + $0x1], 1 }
 0x562   :  { %893 = vsyncpa [#allocation6], 1 }
 0x563   :  { %895 = vsyncpa [#allocation6 + $0x1], 1 }
 0x564   :  { %896 = vsyncpa [#allocation9], 1 }
 0x565   :  { %897 = vsyncpa [#allocation4], 1 }
 0x566   :  { %899 = vsyncpa [#allocation4 + $0x1], 1 }

</bundles_post_ra>
